<compile_context>
chip_gen: v7x
topology: tpu7x:2x2x1
jax: 0.10.0
libtpu: 0.0.40
codegen_flags: <defaults>
</compile_context>

<pallas_src>
import functools

import jax
import jax.numpy as jnp
from jax.experimental import pallas as pl
from jax.experimental.pallas import tpu as pltpu


# Only bother single-buffering the resident weight when it is actually big.
_W_SINGLE_BUFFER_BYTES = 4 * 1024 * 1024


def _vmem_capacity_bytes():
    try:
        return int(pltpu.get_tpu_info().vmem_capacity_bytes)
    except Exception:
        return 64 * 1024 * 1024  # conservative default (v7x per-core VMEM)


# ----------------------------- kernels --------------------------------------

def _residual_linear_kernel(x_ref, w_ref, b_ref, o_ref):
    """Resident-weight path: x_ref [TM, H], w_ref [H, H], b_ref [1, H]."""
    x = x_ref[...]
    y = jnp.dot(x, w_ref[...], preferred_element_type=jnp.float32)
    y = y + b_ref[...].astype(jnp.float32) + x.astype(jnp.float32)
    o_ref[...] = y.astype(o_ref.dtype)


def _residual_linear_tiled_kernel(x_ref, w_ref, b_ref, o_ref, acc_ref, *,
                                  tk, ratio):
    """K/N-tiled path: x_ref [TM, TK], w_ref [TK, TN], b_ref [1, TN].

    grid = (M//TM, H//TN, H//TK); acc_ref is a [TM, TN] f32 accumulator.
    The residual is folded into the accumulator: x's K block k holds columns
    [k*tk, (k+1)*tk) of x, which are residual columns of output tile j iff
    j*ratio <= k < (j+1)*ratio (ratio = TN // TK).  Every residual column is
    added exactly once over the K loop, so no separate residual stream of x
    is needed.
    """
    j = pl.program_id(1)
    k = pl.program_id(2)

    @pl.when(k == 0)
    def _init():
        acc_ref[...] = jnp.zeros_like(acc_ref)

    acc_ref[...] += jnp.dot(x_ref[...], w_ref[...],
                            preferred_element_type=jnp.float32)

    rel = k - j * ratio
    if ratio == 1:
        @pl.when(rel == 0)
        def _residual():
            acc_ref[...] += x_ref[...].astype(jnp.float32)
    else:
        @pl.when((rel >= 0) & (rel < ratio))
        def _residual():
            off = pl.multiple_of(rel * tk, tk)
            acc_ref[:, pl.ds(off, tk)] += x_ref[...].astype(jnp.float32)

    @pl.when(k == pl.num_programs(2) - 1)
    def _finalize():
        o_ref[...] = (acc_ref[...]
                      + b_ref[...].astype(jnp.float32)).astype(o_ref.dtype)


# ----------------------------- wrapper ---------------------------------------

def residual_linear(x, w, b, *, tm=None, tk=None, tn=None):
    """Computes Linear(x) + x (Residual(Linear)) with a single Pallas kernel.

    x: [B, S, H], w: [H, H], b: [H].  Returns [B, S, H] in x.dtype.
    """
    B, S, H = x.shape
    M = B * S
    x2d = x.reshape(M, H)
    b2d = b.reshape(1, H)

    isz = jnp.dtype(x.dtype).itemsize
    osz = isz
    cap = _vmem_capacity_bytes()
    budget = cap // 2  # leave headroom for compiler-internal scratch

    tm_cands = [c for c in (2048, 1024, 512, 256, 128, 64, 32, 16, 8)
                if M % c == 0] or [M]
    if tm is not None:
        tm_cands = [tm]

    can_tile_h = (H % 128 == 0)

    single_buffer_w = H * H * isz >= _W_SINGLE_BUFFER_BYTES
    w_bufs = 1 if single_buffer_w else 2

    def single_foot(tm_c):
        return (w_bufs * (H * H + 8 * H) * isz      # resident w + b
                + 2 * tm_c * H * isz                # x stream (double buffered)
                + 2 * tm_c * H * osz)               # out stream

    def tiled_foot(tm_c, tk_c, tn_c):
        return (2 * tm_c * tk_c * isz               # x
                + 2 * tk_c * tn_c * isz             # w
                + 2 * 8 * tn_c * isz                # b
                + 2 * tm_c * tn_c * osz             # out
                + tm_c * tn_c * 4)                  # f32 accumulator

    force_tiled = (tk is not None and tk < H) or (tn is not None and tn < H)
    force_single = not can_tile_h   # (8,128) rule: can't slice H, keep it full

    # -- path selection --------------------------------------------------
    use_single = False
    tm_sel = tm_cands[-1]
    if not force_tiled:
        for c in tm_cands:
            if single_foot(c) <= budget:
                tm_sel = c
                use_single = True
                break
        if force_single and not use_single:
            tm_sel = tm_cands[-1]   # best effort; vmem_limit is clamped below
            use_single = True

    if not use_single:
        # Prefer 256-multiple K slabs (v6e/v7x MXU is 2x256x256); 128 fallback.
        if tk is not None:
            tk_sel = tk
        else:
            base = tn if tn is not None else H
            tk_sel = next((c for c in (512, 256, 128)
                           if H % c == 0 and base % c == 0), 128)
        tn_cands = ([tn] if tn is not None else
                    [c for c in (2048, 1024, 512, 256, 128)
                     if H % c == 0 and c % tk_sel == 0]) or [H]
        best = None
        for tm_c in tm_cands:
            for tn_c in tn_cands:
                if tiled_foot(tm_c, tk_sel, tn_c) <= budget:
                    key = (min(tm_c, tn_c), tm_c + tn_c)
                    if best is None or key > best[0]:
                        best = (key, tm_c, tn_c)
        if best is None:            # nothing fits: take the smallest tiles
            best = (None, tm_cands[-1], tn_cands[-1])
        tm_sel, tn_sel = best[1], best[2]
        assert H % tk_sel == 0 and H % tn_sel == 0 and tn_sel % tk_sel == 0

    # v7x has two TensorCores: make sure the parallel M axis has >= 2 steps.
    if tm is None and (M // tm_sel) < 2 and tm_sel % 16 == 0:
        tm_sel //= 2
    assert M % tm_sel == 0

    foot = single_foot(tm_sel) if use_single else tiled_foot(tm_sel, tk_sel,
                                                             tn_sel)
    vmem_limit = int(min(max(foot * 5 // 4 + (1 << 20), 32 * 1024 * 1024),
                         cap * 9 // 10))

    cost = pl.CostEstimate(
        flops=2 * M * H * H,
        transcendentals=0,
        bytes_accessed=isz * (M * H + H * H + H) + osz * M * H,
    )

    if use_single:
        if single_buffer_w:
            w_spec = pl.BlockSpec((H, H), lambda i: (0, 0),
                                  pipeline_mode=pl.Buffered(1))
            b_spec = pl.BlockSpec((1, H), lambda i: (0, 0),
                                  pipeline_mode=pl.Buffered(1))
        else:
            w_spec = pl.BlockSpec((H, H), lambda i: (0, 0))
            b_spec = pl.BlockSpec((1, H), lambda i: (0, 0))
        grid_spec = pltpu.PrefetchScalarGridSpec(
            num_scalar_prefetch=0,
            grid=(M // tm_sel,),
            in_specs=[
                pl.BlockSpec((tm_sel, H), lambda i: (i, 0)),   # x
                w_spec,                                         # w (resident)
                b_spec,                                         # b (resident)
            ],
            out_specs=pl.BlockSpec((tm_sel, H), lambda i: (i, 0)),
        )
        kernel = _residual_linear_kernel
        dim_sem = ("parallel",)
    else:
        ratio = tn_sel // tk_sel
        grid_spec = pltpu.PrefetchScalarGridSpec(
            num_scalar_prefetch=0,
            grid=(M // tm_sel, H // tn_sel, H // tk_sel),
            in_specs=[
                pl.BlockSpec((tm_sel, tk_sel), lambda i, j, k: (i, k)),  # x
                pl.BlockSpec((tk_sel, tn_sel), lambda i, j, k: (k, j)),  # w
                pl.BlockSpec((1, tn_sel), lambda i, j, k: (0, j)),       # b
            ],
            out_specs=pl.BlockSpec((tm_sel, tn_sel), lambda i, j, k: (i, j)),
            scratch_shapes=[pltpu.VMEM((tm_sel, tn_sel), jnp.float32)],
        )
        kernel = functools.partial(_residual_linear_tiled_kernel,
                                   tk=tk_sel, ratio=ratio)
        dim_sem = ("parallel", "parallel", "arbitrary")

    out = pl.pallas_call(
        kernel,
        out_shape=jax.ShapeDtypeStruct((M, H), x.dtype),
        grid_spec=grid_spec,
        compiler_params=pltpu.CompilerParams(
            dimension_semantics=dim_sem,
            vmem_limit_bytes=vmem_limit),
        cost_estimate=cost,
    )(x2d, w, b2d)
    return out.reshape(B, S, H)


# ------------------------------- test ----------------------------------------

if __name__ == "__main__":
    key = jax.random.PRNGKey(0)
    kx, kw, kb = jax.random.split(key, 3)

    def ref_fn(x, w, b):
        return (jnp.einsum("bsh,hk->bsk",
                           x.astype(jnp.float32), w.astype(jnp.float32))
                + b.astype(jnp.float32) + x.astype(jnp.float32))

    # Test 1: lane-dense hidden (H = 128), auto tiling (resident-weight path).
    B, S, H = 2, 64, 128
    x = jax.random.normal(kx, (B, S, H), dtype=jnp.float32)
    w = jax.random.normal(kw, (H, H), dtype=jnp.float32) / jnp.sqrt(H)
    b = jax.random.normal(kb, (H,), dtype=jnp.float32) * 0.01

    out = residual_linear(x, w, b)
    jax.block_until_ready(out)
    ref = ref_fn(x, w, b)
    assert out.shape == ref.shape
    assert jnp.allclose(out, ref, atol=2e-2, rtol=2e-2)

    # Test 2: K+N tiled path with tn == tk (static residual fold, nn > 1).
    B2, S2, H2 = 2, 64, 256
    x2 = jax.random.normal(kx, (B2, S2, H2), dtype=jnp.float32)
    w2 = jax.random.normal(kw, (H2, H2), dtype=jnp.float32) / jnp.sqrt(H2)
    b2 = jax.random.normal(kb, (H2,), dtype=jnp.float32) * 0.01
    out2 = residual_linear(x2, w2, b2, tm=64, tk=128, tn=128)
    jax.block_until_ready(out2)
    ref2 = ref_fn(x2, w2, b2)
    assert jnp.allclose(out2, ref2, atol=2e-2, rtol=2e-2)

    # Test 3: K+N tiled path with tn > tk (dynamic-slice residual fold).
    out3 = residual_linear(x2, w2, b2, tm=64, tk=128, tn=256)
    jax.block_until_ready(out3)
    assert jnp.allclose(out3, ref2, atol=2e-2, rtol=2e-2)

    # Test 4: bf16 operands feed the MXU directly (f32 accumulation in-kernel).
    xb, wb, bb = (x.astype(jnp.bfloat16), w.astype(jnp.bfloat16),
                  b.astype(jnp.bfloat16))
    out4 = residual_linear(xb, wb, bb)
    jax.block_until_ready(out4)
    ref4 = ref_fn(xb, wb, bb)   # f32 reference on the bf16-quantized inputs
    assert jnp.allclose(out4.astype(jnp.float32), ref4, atol=0.5, rtol=5e-2)

    print("KERNEL_OK")
</pallas_src>

<mosaic_0001>
module attributes {stable_mosaic.version = 11 : i64} {
  func.func @_residual_linear_kernel(%arg0: i32, %arg1: memref<64x128xf32, #tpu.memory_space<vmem>>, %arg2: memref<128x128xf32, #tpu.memory_space<vmem>>, %arg3: memref<1x128xf32, #tpu.memory_space<vmem>>, %arg4: memref<64x128xf32, #tpu.memory_space<vmem>>) attributes {dimension_semantics = [#tpu.dimension_semantics<parallel>], iteration_bounds = array<i64: 2>, scalar_prefetch = 0 : i64, scratch_operands = 0 : i64, tpu.core_type = #tpu.core_type<tc>, window_params = [{transform_indices = @transform_0, window_bounds = array<i64: 64, 128>}, {pipeline_mode = #tpu.pipeline_mode<synchronous>, transform_indices = @transform_1, window_bounds = array<i64: 128, 128>}, {pipeline_mode = #tpu.pipeline_mode<synchronous>, transform_indices = @transform_2, window_bounds = array<i64: 1, 128>}, {transform_indices = @transform_3, window_bounds = array<i64: 64, 128>}]} {
    %c0 = arith.constant 0 : index
    %c0_0 = arith.constant 0 : index
    %0 = vector.load %arg1[%c0, %c0_0] : memref<64x128xf32, #tpu.memory_space<vmem>>, vector<64x128xf32>
    %c0_1 = arith.constant 0 : index
    %c0_2 = arith.constant 0 : index
    %1 = vector.load %arg2[%c0_1, %c0_2] : memref<128x128xf32, #tpu.memory_space<vmem>>, vector<128x128xf32>
    %cst = arith.constant dense<0.000000e+00> : vector<64x128xf32>
    %2 = tpu.matmul %0, %1, %cst {dimension_numbers = #tpu.dot_dimension_numbers<[1], [0], [0], [1], [0, 0, 1, 1], [], []>} : vector<64x128xf32>, vector<128x128xf32>, vector<64x128xf32> -> vector<64x128xf32>
    %c0_3 = arith.constant 0 : index
    %c0_4 = arith.constant 0 : index
    %3 = vector.load %arg3[%c0_3, %c0_4] : memref<1x128xf32, #tpu.memory_space<vmem>>, vector<1x128xf32>
    %4 = vector.broadcast %3 : vector<1x128xf32> to vector<64x128xf32>
    %5 = arith.addf %2, %4 : vector<64x128xf32>
    %6 = arith.addf %5, %0 : vector<64x128xf32>
    %c0_5 = arith.constant 0 : index
    %c0_6 = arith.constant 0 : index
    %7 = vector.load %arg4[%c0_5, %c0_6] : memref<64x128xf32, #tpu.memory_space<vmem>>, vector<64x128xf32>
    tpu.vector_store %arg4[%c0_5, %c0_6], %6 {strides = array<i32>} : memref<64x128xf32, #tpu.memory_space<vmem>>, vector<64x128xf32>,
    return
  }
  func.func @transform_0(%arg0: i32) -> (i32, i32) {
    %c0_i32 = arith.constant 0 : i32
    %c0_i32_0 = arith.constant 0 : i32
    return %arg0, %c0_i32 : i32, i32
  }
  func.func @transform_1(%arg0: i32) -> (i32, i32) {
    %c0_i32 = arith.constant 0 : i32
    %c0_i32_0 = arith.constant 0 : i32
    %c0_i32_1 = arith.constant 0 : i32
    return %c0_i32, %c0_i32_0 : i32, i32
  }
  func.func @transform_2(%arg0: i32) -> (i32, i32) {
    %c0_i32 = arith.constant 0 : i32
    %c0_i32_0 = arith.constant 0 : i32
    %c0_i32_1 = arith.constant 0 : i32
    return %c0_i32, %c0_i32_0 : i32, i32
  }
  func.func @transform_3(%arg0: i32) -> (i32, i32) {
    %c0_i32 = arith.constant 0 : i32
    %c0_i32_0 = arith.constant 0 : i32
    return %arg0, %c0_i32 : i32, i32
  }
}

</mosaic_0001>

<bundles_post_ra>
// kernel: tpu_custom_call.1
= control target key start
LH: loop header
LB: loop body
LE: loop exit
PB: predicated region body
PF: predicated region fallthrough
CT: control target
= control target key end

     0   :  { %8 = vsyncpa [#allocation3], 0  ;;  %s1040_s0 = inlined_call_operand.hbm [shape: f32[128,128], index: 0, kind: input, shape index: {}]   ;;  %s1041_s1 = inlined_call_operand.hbm [shape: f32[128,128], index: 1, kind: input, shape index: {}]   ;;  %s1042_s2 = inlined_call_operand.vmem [shape: f32[1,128], index: 2, kind: input, shape index: {}]   ;;  %s1043_s3 = inlined_call_operand.hbm [shape: f32[128,128], index: 3, kind: output, shape index: {}]  }
   0x1   :  { %10 = vsyncpa [#allocation3 + $0x1], 0 }
   0x2   :  { %11 = vsyncpa [#allocation6], 0 }
   0x3   :  { %12 = vsyncpa [#allocation4], 0 }
   0x4   :  { %14 = vsyncpa [#allocation4 + $0x1], 0  ;;  %s808_s12 = smov 0   ;;  %s810_s13 = smov 0  }
   0x5   :  { %s812_s14 = smov 0   ;;  %s814_s15 = smov 0  }
   0x6 LB: > { %s829_s16 = sadd.s32 4294967295, %s779_s15   ;;  %s455_s17 = sadd.s32 4294967294, %s779_s15   ;;  %s779_s15 = sphi %s814_s15, %s1063_s15   ;;  %s775_s14 = sphi %s812_s14, %s1062_s14   ;;  %s771_s13 = sphi %s810_s13, %s1061_s13   ;;  %s767_s12 = sphi %s808_s12, %s1060_s12  }
   0x7   : > { %p40_p0 = scmp.ne.s32.totalorder %s771_s13, %s767_s12  ;;  %p1044_p1 = scmp.eq.s32.totalorder %s829_s16, 0 }
   0x8   : > { %p112_p3 = scmp.eq.s32.totalorder %s455_s17, 1  ;;  %p456_p5 = scmp.ge.s32.totalorder %s779_s15, 1 }
   0x9   : > { %p838_p4 = por %p1044_p1, %p40_p0  ;;  %p119_p7 = scmp.lt.s32.totalorder %s779_s15, 3 }
   0xa   : > { %p843_p6 = por %p112_p3, %p40_p0  ;;  %s781_s21 = smov [#allocation5]  }
   0xb   : > { %s1047_s18 = scalar_select %p838_p4, 1, 0 }
   0xc   : > { %s1048_s19 = scalar_select %p843_p6, 1, 0 }
   0xd   : > { %p848_p8 = pnand %p456_p5, %p119_p7  ;;  %s131_s22 = sshll.u32 %s781_s21, 4  ;;  %s852_s22 = int_to_ptr.vmem [resolvable:$true] %s131_s22 }
   0xe   : > { %s864_s24 = sadd.s32 1, %s779_s15   ;;  %s27_s25 = sadd.s32 1, %s775_s14 }
   0xf   : > { %s1049_s20 = scalar_select %p848_p8, 1, 0 }
  0x10   : > { %p598_p9 = pneg %p848_p8  ;;  %s24_s26 = ssub.s32 %s779_s15, %s864_s24 }
  0x11   : > { %s651_s29 = scalar_lea.hbm %s1041_s1, 2048 }
  0x12   : > { %p859_p11 = pnand %p598_p9, %p1044_p1  ;;  %p652_p12 = scmp.ne.s32.totalorder %s1041_s1, %s651_s29 }
  0x13   : > { %p658_p5 = scmp.lt.u32.totalorder %s651_s29, %s1041_s1 }
  0x14   : > { %p653_p13 = pneg %p859_p11 }
  0x16   : > { %p654_p0 = pnand %p653_p13, %p652_p12 }
  0x18   : > { %p655_p3 = pneg %p654_p0 }
  0x1a   : > { %p660_p7 = pnand %p658_p5, %p655_p3 }
  0x1c   : > { %663 = shalt.err (!%p660_p7)
}
  0x1d   : > { %s664_s7 = scalar_lea.vmem %s852_s22, 2048  ;;  %p672_p2 = scmp.lt.s32.totalorder %s852_s22, %s852_s22 }
  0x1e   : > { %p665_p9 = scmp.ne.s32.totalorder %s852_s22, %s664_s7  ;;  %p673_p6 = scmp.lt.s32.totalorder %s664_s7, %s664_s7 }
  0x20   : > { %p667_p10 = pnand %p665_p9, %p653_p13  ;;  %p674_p4 = por %p673_p6, %p672_p2 }
  0x22   : > { %p668_p1 = pneg %p667_p10 }
  0x24   : > { %p675_p8 = pnand %p674_p4, %p668_p1 }
  0x26   : > { %678 = shalt.err (!%p675_p8)
}
  0x27   : > { %s782_s8 = smov 128   ;;  %s783_s9 = smov 8  }
  0x28   : > { %601 = dma.hbm_to_vmem [thread:$0]  (!%p859_p11), %s1041_s1, 2048, %s852_s22, [#allocation6], %s782_s8, %s782_s8, %s783_s9  }
  0x29   : > { %p25_p1 = scmp.eq.s32.totalorder %s24_s26, 0  ;;  %p34_p2 = scmp.ne.s32.totalorder %s775_s14, %s771_s13 }
  0x2a   : > { %p35_p4 = scmp.eq.s32.totalorder %s779_s15, 0  ;;  %p611_p6 = scmp.lt.s32.totalorder %s779_s15, 2 }
  0x2b   : > { %s898_s17 = scalar_select %p25_p1, %s775_s14, %s27_s25  }
  0x2c   : > { %p36_p8 = por %p35_p4, %p34_p2  ;;  %p1051_p10 = scmp.eq.s32.totalorder %s829_s16, 1 }
  0x2d   : > { %s148_s23 = sand.u32 1, %s775_s14   ;;  %s472_s27 = sshll.u32 %s779_s15, 10 }
  0x2e   : > { %p902_p12 = por %p1051_p10, %p34_p2  ;;  %s459_s28 = sshll.u32 %s148_s23, 6 }
  0x2f   : > { %s911_s4 = scalar_lea.hbm %s1040_s0, %s472_s27  ;;  %s152_s22 = scalar_lea.vmem [#allocation2], %s459_s28 }
  0x30   : > { %s159_s25 = sshll.u32 %s152_s22, 4  ;;  %p913_p11 = pnand %p611_p6, %p36_p8  ;;  %s917_s25 = int_to_ptr.vmem [resolvable:$true] %s159_s25 }
  0x31   : > { %s919_s5 = scalar_lea.sflag [#allocation3], %s148_s23  ;;  %s679_s6 = scalar_lea.hbm %s911_s4, 1024 }
  0x32   : > { %p680_p13 = scmp.ne.s32.totalorder %s911_s4, %s679_s6  ;;  %p681_p0 = pneg %p913_p11 }
  0x33   : > { %s684_s11 = scalar_lea.hbm %s1040_s0, 2048  ;;  %p685_p7 = scmp.lt.u32.totalorder %s911_s4, %s1040_s0 }
  0x34   : > { %p682_p3 = pnand %p681_p0, %p680_p13  ;;  %p686_p9 = scmp.lt.u32.totalorder %s684_s11, %s679_s6 }
  0x35   : > { %p688_p2 = scmp.lt.u32.totalorder %s679_s6, %s911_s4 }
  0x36   : > { %p683_p5 = pneg %p682_p3  ;;  %p687_p1 = por %p686_p9, %p685_p7 }
  0x38   : > { %p689_p4 = por %p688_p2, %p687_p1 }
  0x3a   : > { %p690_p6 = pnand %p689_p4, %p683_p5 }
  0x3c   : > { %693 = shalt.err (!%p690_p6)
}
  0x3d   : > { %s694_s23 = scalar_lea.vmem %s917_s25, 1024  ;;  %s784_s29 = smov [#allocation2]  }
  0x3e   : > { %p695_p8 = scmp.ne.s32.totalorder %s917_s25, %s694_s23  ;;  %s699_s30 = sshll.u32 %s784_s29, 4  ;;  %s700_s30 = int_to_ptr.vmem [resolvable:$false] %s699_s30 }
  0x3f   : > { %s701_s22 = scalar_lea.vmem %s700_s30, 2048  ;;  %p702_p3 = scmp.lt.s32.totalorder %s917_s25, %s700_s30 }
  0x40   : > { %p697_p10 = pnand %p695_p8, %p681_p0  ;;  %p703_p7 = scmp.lt.s32.totalorder %s701_s22, %s694_s23 }
  0x42   : > { %p698_p13 = pneg %p697_p10  ;;  %p704_p9 = por %p703_p7, %p702_p3 }
  0x44   : > { %p705_p1 = pnand %p704_p9, %p698_p13 }
  0x46   : > { %708 = shalt.err (!%p705_p1)
}
  0x47   : > { %605 = dma.hbm_to_vmem [thread:$0]  (!%p913_p11), %s911_s4, 1024, %s917_s25, %s919_s5, %s782_s8, %s782_s8, %s783_s9  }
  0x48   : > { %p1054_p0 = scmp.ne.s32.totalorder %s1049_s20, 0 }
  0x49   : > { %s953_s6 = sand.u32 (!%p1054_p0), 1, %s771_s13   ;;  %p1055_p5 = scmp.ne.s32.totalorder (!%p1054_p0), %s1047_s18, 0 }
  0x4a   : > { %171 = sbr.rel (%p1054_p0) target bundleno = 356 (0x164), region = 32  ;;  %s463_s7 = sshll.u32 (!%p1054_p0), %s953_s6, 6 }
  0x4b   : > { %s174_s10 = scalar_lea.sflag (!%p1054_p0), [#allocation3], %s953_s6  ;;  %s959_s26 = scalar_lea.vmem (!%p1054_p0), [#allocation2], %s463_s7 }
  0x51   : > { %754 = dma.done.wait (%p1055_p5), %s174_s10, 1024  }
  0x52   : > { %756 = vsyncadd (%p1055_p5), %s174_s10, 4294966272  ;;  %p1056_p11 = scmp.eq.s32.totalorder %s829_s16, 0 }
  0x54   : > { %758 = dma.done.wait (%p1056_p11), [#allocation6], 2048   ;;  %p1057_p2 = pmov %p1056_p11 }
  0x55   : > { %v214_v0 = vld [vmem:[#allocation5] sm:$0xff]  ;;  %v215_v1 = vld [vmem:[#allocation5 + $0x8] sm:$0xff]  ;;  %v216_v2 = vld [vmem:[#allocation5 + $0x10] sm:$0xff]  ;;  %s203_s8 = scalar_lea.vmem [#allocation7], %s463_s7  ;;  %s473_s4 = sshll.u32 %s829_s16, 10 }
  0x56   : > { %760 = vsyncadd (%p1057_p2), [#allocation6], 4294965248  ;;  %v542_v3 = vpack.c.bf16 %v215_v1, %v214_v0  ;;  %v217_v4 = vld [vmem:[#allocation5 + $0x18] sm:$0xff]  ;;  %v218_v6 = vld [vmem:[#allocation5 + $0x20] sm:$0xff]  ;;  %s372_s9 = sshll.u32 %s203_s8, 4  ;;  %s996_s5 = scalar_lea.hbm %s1043_s3, %s473_s4  ;;  %s991_s9 = int_to_ptr.vmem [resolvable:$true] %s372_s9 }
  0x57   : > { %v546_v5 = vpack.c.bf16 %v217_v4, %v216_v2  ;;  %v219_v7 = vld [vmem:[#allocation5 + $0x28] sm:$0xff]  ;;  %v970_v9 = vld [vmem:[%s959_s26] sm:$0xff]  ;;  %v220_v11 = vld [vmem:[#allocation5 + $0x30] sm:$0xff]  ;;  %s359_s11 = scalar_lea.sflag [#allocation4], %s953_s6  ;;  %s709_s27 = scalar_lea.vmem %s991_s9, 1024 }
  0x58   : > { %543 = vmatprep.subr.bf16.mxu0 %v542_v3  ;;  %574 = vmatprep.subr.bf16.mxu1 %v542_v3  ;;  %v550_v8 = vpack.c.bf16 %v219_v7, %v218_v6  ;;  %v973_v10 = vld [vmem:[%s959_s26 + $0x20] sm:$0xff]  ;;  %v221_v12 = vld [vmem:[#allocation5 + $0x38] sm:$0xff]  ;;  %v223_v15 = vld [vmem:[#allocation5 + $0x48] sm:$0xff]  ;;  %p710_p4 = scmp.ne.s32.totalorder %s991_s9, %s709_s27  ;;  %s785_s28 = smov [#allocation7]  }
  0x59   : > { %545 = vmatpush3.bf16.msra.mxu0 %v542_v3  ;;  %582 = vmatpush3.bf16.msra.mxu1 %v542_v3  ;;  %v554_v13 = vpack.c.bf16 %v221_v12, %v220_v11  ;;  %v222_v14 = vld [vmem:[#allocation5 + $0x40] sm:$0xff]  ;;  %v224_v17 = vld [vmem:[#allocation5 + $0x50] sm:$0xff]  ;;  %v225_v18 = vld [vmem:[#allocation5 + $0x58] sm:$0xff]  ;;  %s713_s23 = sshll.u32 %s785_s28, 4  ;;  %s714_s23 = int_to_ptr.vmem [resolvable:$false] %s713_s23 }
  0x5a   : > { %547 = vmatprep.subr.bf16.mxu0 %v546_v5  ;;  %575 = vmatprep.subr.bf16.mxu1 %v546_v5  ;;  %v558_v16 = vpack.c.bf16 %v223_v15, %v222_v14  ;;  %v562_v19 = vpack.c.bf16 %v225_v18, %v224_v17  ;;  %v226_v20 = vld [vmem:[#allocation5 + $0x60] sm:$0xff]  ;;  %v227_v21 = vld [vmem:[#allocation5 + $0x68] sm:$0xff]  ;;  %v228_v23 = vld [vmem:[#allocation5 + $0x70] sm:$0xff]  ;;  %p711_p6 = pnand %p710_p4, %p902_p12  ;;  %s715_s29 = scalar_lea.vmem %s714_s23, 2048 }
  0x5b   : > { %530 = vmatprep.mubr.f32.mxu0 %v970_v9  ;;  %536 = vmatprep.mubr.f32.mxu1 %v973_v10  ;;  %v566_v22 = vpack.c.bf16 %v227_v21, %v226_v20  ;;  %v229_v24 = vld [vmem:[#allocation5 + $0x78] sm:$0xff]  ;;  %v207_v26 = vld [vmem:[%s959_s26 + $0x8] sm:$0xff]  ;;  %v208_v28 = vld [vmem:[%s959_s26 + $0x10] sm:$0xff]  ;;  %p716_p10 = scmp.lt.s32.totalorder %s991_s9, %s714_s23  ;;  %p717_p13 = scmp.lt.s32.totalorder %s715_s29, %s709_s27 }
  0x5c   : > { %v570_v25 = vpack.c.bf16 %v229_v24, %v228_v23  ;;  %v211_v27 = vld [vmem:[%s959_s26 + $0x28] sm:$0xff]  ;;  %v212_v29 = vld [vmem:[%s959_s26 + $0x30] sm:$0xff]  ;;  %v209_v30 = vld [vmem:[%s959_s26 + $0x18] sm:$0xff]  ;;  %p712_p8 = pneg %p711_p6 }
  0x5d   : > { %549 = vmatpush3.bf16.msra.mxu0 %v546_v5  ;;  %583 = vmatpush3.bf16.msra.mxu1 %v546_v5  ;;  %v213_v31 = vld [vmem:[%s959_s26 + $0x38] sm:$0xff]  ;;  %v466_v32 = vld [vmem:[%s1042_s2] ss:$0 sm:$0xff]  ;;  %p718_p3 = por %p717_p13, %p716_p10 }
  0x5e   : > { %551 = vmatprep.subr.bf16.mxu0 %v550_v8  ;;  %576 = vmatprep.subr.bf16.mxu1 %v550_v8 }
  0x5f   : > { %p719_p7 = pnand %p718_p3, %p712_p8 }
  0x61   : > { %553 = vmatpush3.bf16.msra.mxu0 %v550_v8  ;;  %584 = vmatpush3.bf16.msra.mxu1 %v550_v8 }
  0x62   : > { %555 = vmatprep.subr.bf16.mxu0 %v554_v13  ;;  %577 = vmatprep.subr.bf16.mxu1 %v554_v13 }
  0x65   : > { %557 = vmatpush3.bf16.msra.mxu0 %v554_v13  ;;  %585 = vmatpush3.bf16.msra.mxu1 %v554_v13 }
  0x66   : > { %559 = vmatprep.subr.bf16.mxu0 %v558_v16  ;;  %578 = vmatprep.subr.bf16.mxu1 %v558_v16 }
  0x69   : > { %561 = vmatpush3.bf16.msra.mxu0 %v558_v16  ;;  %586 = vmatpush3.bf16.msra.mxu1 %v558_v16 }
  0x6a   : > { %563 = vmatprep.subr.bf16.mxu0 %v562_v19  ;;  %579 = vmatprep.subr.bf16.mxu1 %v562_v19 }
  0x6d   : > { %565 = vmatpush3.bf16.msra.mxu0 %v562_v19  ;;  %587 = vmatpush3.bf16.msra.mxu1 %v562_v19 }
  0x6e   : > { %567 = vmatprep.subr.bf16.mxu0 %v566_v22  ;;  %580 = vmatprep.subr.bf16.mxu1 %v566_v22 }
  0x71   : > { %569 = vmatpush3.bf16.msra.mxu0 %v566_v22  ;;  %588 = vmatpush3.bf16.msra.mxu1 %v566_v22 }
  0x72   : > { %571 = vmatprep.subr.bf16.mxu0 %v570_v25  ;;  %581 = vmatprep.subr.bf16.mxu1 %v570_v25 }
  0x75   : > { %573 = vmatpush3.bf16.msra.mxu0 %v570_v25  ;;  %589 = vmatpush3.bf16.msra.mxu1 %v570_v25 }
  0x78   : > { %531 = vmatmul.mubr.f32.vlgmr.msra.gmra.mrb[0].mxu0 %v207_v26  ;;  %537 = vmatmul.mubr.f32.vlgmr.msra.gmra.mrb[0].mxu1 %v211_v27 }
  0x79   : > { %533 = vmatprep.mubr.f32.mxu0 %v208_v28  ;;  %539 = vmatprep.mubr.f32.mxu1 %v212_v29 }
  0x7c   : > { %534 = vmatmul.mubr.f32.gmra.mrb[2].mxu0 %v209_v30  ;;  %540 = vmatmul.mubr.f32.gmra.mrb[2].mxu1 %v213_v31 }
 0x14b   : > { %v532_v33 = vpop.f32.mrb[0].mxu0  ;;  %v538_v34 = vpop.f32.mrb[0].mxu1 }
 0x14c   : > { %v309_v35 = vadd.f32 %v532_v33, %v466_v32  ;;  %v329_v36 = vadd.f32 %v538_v34, %v466_v32  ;;  %v303_v37 = vpop.f32.mrb[1].mxu0  ;;  %v323_v38 = vpop.f32.mrb[1].mxu1 }
 0x14d   : > { %v304_v39 = vadd.f32 %v466_v32, %v303_v37  ;;  %v324_v40 = vadd.f32 %v466_v32, %v323_v38 }
 0x14e   : > { %v343_v41 = vadd.f32 %v309_v35, %v207_v26  ;;  %v347_v42 = vadd.f32 %v329_v36, %v211_v27 }
 0x14f   : > { %v342_v43 = vadd.f32 %v304_v39, %v970_v9  ;;  %v346_v44 = vadd.f32 %v324_v40, %v973_v10  ;;  %v535_v45 = vpop.f32.mrb[2].mxu0  ;;  %v541_v46 = vpop.f32.mrb[2].mxu1 }
 0x150   : > { %351 = vst [vmem:[%s203_s8 + $0x8] sm:$0xff] %v343_v41  ;;  %355 = vst [vmem:[%s203_s8 + $0x28] sm:$0xff] %v347_v42  ;;  %v319_v47 = vadd.f32 %v535_v45, %v466_v32  ;;  %v339_v48 = vadd.f32 %v541_v46, %v466_v32  ;;  %v313_v49 = vpop.f32.mrb[3].mxu0  ;;  %v333_v50 = vpop.f32.mrb[3].mxu1 }
 0x151   : > { %350 = vst [vmem:[%s203_s8] sm:$0xff] %v342_v43  ;;  %354 = vst [vmem:[%s203_s8 + $0x20] sm:$0xff] %v346_v44  ;;  %v314_v51 = vadd.f32 %v466_v32, %v313_v49  ;;  %v334_v52 = vadd.f32 %v466_v32, %v333_v50 }
 0x152   : > { %v345_v53 = vadd.f32 %v319_v47, %v209_v30  ;;  %v349_v54 = vadd.f32 %v339_v48, %v213_v31 }
 0x153   : > { %v344_v55 = vadd.f32 %v314_v51, %v208_v28  ;;  %v348_v56 = vadd.f32 %v334_v52, %v212_v29 }
 0x154   : > { %353 = vst [vmem:[%s203_s8 + $0x18] sm:$0xff] %v345_v53  ;;  %357 = vst [vmem:[%s203_s8 + $0x38] sm:$0xff] %v349_v54 }
 0x155   : > { %352 = vst [vmem:[%s203_s8 + $0x10] sm:$0xff] %v344_v55  ;;  %356 = vst [vmem:[%s203_s8 + $0x30] sm:$0xff] %v348_v56 }
 0x156   : > { %722 = shalt.err (!%p719_p7)
}
 0x157   : > { %s723_s30 = scalar_lea.hbm %s996_s5, 1024  ;;  %s727_s10 = scalar_lea.hbm %s1043_s3, 2048 }
 0x158   : > { %p724_p9 = scmp.ne.s32.totalorder %s996_s5, %s723_s30  ;;  %p728_p5 = scmp.lt.u32.totalorder %s996_s5, %s1043_s3 }
 0x159   : > { %p729_p11 = scmp.lt.u32.totalorder %s727_s10, %s723_s30  ;;  %p731_p4 = scmp.lt.u32.totalorder %s723_s30, %s996_s5 }
 0x15a   : > { %p725_p1 = pnand %p724_p9, %p902_p12 }
 0x15b   : > { %p730_p2 = por %p729_p11, %p728_p5 }
 0x15c   : > { %p726_p0 = pneg %p725_p1 }
 0x15d   : > { %p732_p6 = por %p731_p4, %p730_p2 }
 0x15f   : > { %p733_p8 = pnand %p732_p6, %p726_p0 }
 0x161   : > { %736 = shalt.err (!%p733_p8)
}
 0x162   : > { %s786_s20 = smov 128   ;;  %s787_s8 = smov 8  }
 0x163   : > { %596 = dma.vmem_to_hbm [thread:$0]  (%p902_p12), %s991_s9, 1024, %s996_s5, %s359_s11, %s786_s20, %s786_s20, %s787_s8  }
 0x164 PF: > { %s387_s4 = sand.u32 1, %s767_s12   ;;  %p1058_p10 = scmp.ne.s32.totalorder %s1048_s19, 0 }
 0x165   : > { %p1059_p13 = scmp.ge.s32.totalorder %s779_s15, 2  ;;  %s388_s25 = scalar_lea.sflag [#allocation4], %s387_s4 }
 0x167   : > { %p607_p3 = pnand %p1059_p13, %p1058_p10 }
 0x169   : > { %762 = dma.done.wait (!%p607_p3), %s388_s25, 1024  }
 0x16a   : > { %764 = vsyncadd (!%p607_p3), %s388_s25, 4294966272  ;;  %p17_p7 = scmp.ge.s32.totalorder %s864_s24, 4   ;;  %s1060_s12 = smov %s771_s13 }
 0x16b   : > { %s1061_s13 = smov %s775_s14  ;;  %s1062_s14 = smov %s898_s17 }
 0x16c   : > { %s1063_s15 = smov %s864_s24  ;;  %19 = sbr.rel (!%p17_p7) target bundleno = 6 (0x6), region = 81 }
 0x173   :  { %393 = vsyncpa [#allocation3], 1 }
 0x174   :  { %395 = vsyncpa [#allocation3 + $0x1], 1 }
 0x175   :  { %396 = vsyncpa [#allocation6], 1 }
 0x176   :  { %397 = vsyncpa [#allocation4], 1 }
 0x177   :  { %399 = vsyncpa [#allocation4 + $0x1], 1 }

</bundles_post_ra>
